<compile_context>
chip_gen: v6e
topology: v6e:2x2x1
jax: 0.10.0
libtpu: 0.0.40
codegen_flags: <defaults>
</compile_context>

<pallas_src>
import functools

import numpy as np
import jax
import jax.numpy as jnp
from jax import lax
from jax.experimental import pallas as pl
from jax.experimental.pallas import tpu as pltpu


# ----------------------------------------------------------------------------
# One-time probe of pltpu.roll's shift direction so the tap shifts can never be
# flipped.  Runs a trivial eager pallas_call once (cached, ~compile-time only).
# ----------------------------------------------------------------------------
@functools.lru_cache(maxsize=None)
def _roll_is_numpy_style() -> bool:
    def kernel(x_ref, o_ref):
        o_ref[...] = pltpu.roll(x_ref[...], 1, axis=1)

    with jax.ensure_compile_time_eval():
        x = jnp.arange(8 * 128, dtype=jnp.float32).reshape(8, 128)
        y = pl.pallas_call(
            kernel, out_shape=jax.ShapeDtypeStruct((8, 128), jnp.float32))(x)
        return bool(float(y[0, 0]) == float(x[0, 127]))  # np.roll: y[0,0]==x[0,-1]


# ----------------------------------------------------------------------------
# Fused kernel: one grid step == one batch element.
# Internal layout: (channels, H*W)  -> channels on sublanes, pixels on lanes.
# ----------------------------------------------------------------------------
def _sk_basic_kernel(x_ref, hh_ref, ww_ref, w1c_ref, b1_ref, w2t_ref, b2_ref,
                     wred_ref, battn_ref, wsel_ref, out_ref, slab_ref,
                     *, H, W, Cin, C, A, half, np_roll):
    N = H * W
    xv = x_ref[0]              # (Cin, N)  f32
    hh = hh_ref[...]           # (1, N) int32: pixel row index
    ww = ww_ref[...]           # (1, N) int32: pixel col index

    def tap(src, kh, kw, d):
        """src shifted so lane i holds src[:, pixel (h+kh*d-d, w+kw*d-d)];
        out-of-image taps ('same' padding) are zeroed with a lane mask."""
        dh = kh * d - d
        dw = kw * d - d
        delta = dh * W + dw
        if delta == 0:
            shifted = src
        else:
            amt = (-delta) % N if np_roll else delta % N
            shifted = pltpu.roll(src, amt, axis=1)      # XLU, lane rotation
        conds = []
        if dh < 0:
            conds.append(hh >= -dh)
        if dh > 0:
            conds.append(hh < H - dh)
        if dw < 0:
            conds.append(ww >= -dw)
        if dw > 0:
            conds.append(ww < W - dw)
        if not conds:
            return shifted
        m = conds[0]
        for c in conds[1:]:
            m = m & c
        return jnp.where(m, shifted, 0.0)

    # ---- conv1: both SK paths in ONE im2col slab + ONE MXU matmul ----------
    # slab rows [t*Cin, t*Cin+half)  = path0 tap t (dilation 1) of x[:half]
    # slab rows [t*Cin+half, (t+1)*Cin) = path1 tap t (dilation 2) of x[half:]
    rows = lax.broadcasted_iota(jnp.int32, (Cin, 1), 0)
    is_path0 = rows < half
    t = 0
    for kh in range(3):
        for kw in range(3):
            blk = jnp.where(is_path0, tap(xv, kh, kw, 1), tap(xv, kh, kw, 2))
            slab_ref[t * Cin:(t + 1) * Cin, :] = blk
            t += 1
    y1 = jnp.dot(w1c_ref[...], slab_ref[...],
                 preferred_element_type=jnp.float32)      # (2C, N)
    y1 = jnp.maximum(y1 + b1_ref[...], 0.0)               # BN bias + ReLU
    p0 = y1[:C]                                            # (C, N)
    p1 = y1[C:]                                            # (C, N)

    # ---- SK attention: sum -> global mean -> fc_reduce+BN+ReLU -> fc_select
    #      -> softmax over the 2 paths -> weighted path mix --------------------
    s = p0 + p1                                            # (C, N)
    zmap = jnp.dot(wred_ref[...], s,
                   preferred_element_type=jnp.float32)     # (A, N) (linear, so
    z = jnp.sum(zmap, axis=1, keepdims=True) * (1.0 / N)   #  mean commutes)
    z = jnp.maximum(z + battn_ref[...], 0.0)               # (A, 1)
    zb = jnp.broadcast_to(z, (A, N))                       # keep matmul N=256
    logits = jnp.dot(wsel_ref[...], zb,
                     preferred_element_type=jnp.float32)   # (2C, N)
    a0 = logits[:C]
    a1 = logits[C:]
    mx = jnp.maximum(a0, a1)
    e0 = jnp.exp(a0 - mx)
    e1 = jnp.exp(a1 - mx)
    inv = 1.0 / (e0 + e1)
    sel = p0 * (e0 * inv) + p1 * (e1 * inv)                # (C, N)

    # ---- conv2 + BN (no act) + residual add + final ReLU --------------------
    t = 0
    for kh in range(3):
        for kw in range(3):
            slab_ref[t * C:(t + 1) * C, :] = tap(sel, kh, kw, 1)
            t += 1
    y2 = jnp.dot(w2t_ref[...], slab_ref[...],
                 preferred_element_type=jnp.float32) + b2_ref[...]   # (C, N)
    out_ref[...] = jnp.maximum(y2 + xv, 0.0)[None].astype(out_ref.dtype)


# ----------------------------------------------------------------------------
# Weight packing (wrapper side, tiny, constant-folded by XLA):
# fold BN scale into the conv weights and lay them out for the im2col matmuls.
# ----------------------------------------------------------------------------
def _pack_conv1_weights(w_p0, w_p1, s_p0, s_p1):
    half, C = w_p0.shape[2], w_p0.shape[3]
    w0 = w_p0 * s_p0[None, None, None, :]
    w1 = w_p1 * s_p1[None, None, None, :]
    zero = jnp.zeros((C, half), jnp.float32)
    blocks = []
    for kh in range(3):
        for kw in range(3):
            top = jnp.concatenate([w0[kh, kw].T, zero], axis=1)   # path0 outs
            bot = jnp.concatenate([zero, w1[kh, kw].T], axis=1)   # path1 outs
            blocks.append(jnp.concatenate([top, bot], axis=0))    # (2C, 2*half)
    return jnp.concatenate(blocks, axis=1)                        # (2C, 9*Cin)


def _pack_conv2_weights(w_c2, s_c2):
    w = w_c2 * s_c2[None, None, None, :]
    blocks = [w[kh, kw].T for kh in range(3) for kw in range(3)]  # (C, Cin) each
    return jnp.concatenate(blocks, axis=1)                        # (C, 9*Cin)


# ----------------------------------------------------------------------------
# Full block wrapper: only free reshapes + tiny weight packing outside Pallas.
# ----------------------------------------------------------------------------
def selective_kernel_basic(x_nchw, p):
    B, Cin, H, W = x_nchw.shape
    N = H * W
    half = p["w_p0"].shape[2]
    C = p["w_p0"].shape[3]
    A = p["w_red"].shape[1]
    assert Cin == 2 * half, "split_input=True needs an even channel split"
    assert Cin == C, "identity shortcut (downsample=None) needs inplanes==planes"

    w1c = _pack_conv1_weights(p["w_p0"], p["w_p1"], p["s_p0"], p["s_p1"])
    b1 = jnp.concatenate([p["b_p0"], p["b_p1"]]).reshape(2 * C, 1)
    w2t = _pack_conv2_weights(p["w_c2"], p["s_c2"])
    b2 = p["b_c2"].reshape(C, 1)
    wred = p["s_attn"][:, None] * p["w_red"].T              # (A, C), BN folded
    battn = p["b_attn"].reshape(A, 1)
    wsel = jnp.concatenate([p["w_sel0"].T, p["w_sel1"].T], axis=0)  # (2C, A)

    # pixel coordinate tables for the boundary masks (1 KiB, fetched once)
    hh_idx = (jnp.arange(N, dtype=jnp.int32) // W).reshape(1, N)
    ww_idx = (jnp.arange(N, dtype=jnp.int32) % W).reshape(1, N)

    # NCHW is already the layout we want (channels x pixels) -> free reshape.
    x_flat = x_nchw.reshape(B, Cin, N)

    kernel = functools.partial(
        _sk_basic_kernel, H=H, W=W, Cin=Cin, C=C, A=A, half=half,
        np_roll=_roll_is_numpy_style())

    flops = B * (2 * (2 * C) * (9 * Cin) * N          # fused path convs
                 + 2 * C * (9 * C) * N                # conv2
                 + 2 * A * C * N + 2 * (2 * C) * A * N)   # attention matmuls
    bytes_accessed = 4 * (x_flat.size + B * C * N + w1c.size + b1.size
                          + w2t.size + b2.size + wred.size + battn.size
                          + wsel.size + hh_idx.size + ww_idx.size)

    # TODO(synk): for production-sized skresnet stages, tile H (with a halo) and
    # store the block output in bf16 to stay inside v7x's 64 MiB VMEM budget.
    out_flat = pl.pallas_call(
        kernel,
        out_shape=jax.ShapeDtypeStruct((B, C, N), jnp.float32),
        grid_spec=pltpu.PrefetchScalarGridSpec(
            num_scalar_prefetch=0,
            grid=(B,),
            in_specs=[
                pl.BlockSpec((1, Cin, N), lambda b: (b, 0, 0)),
                pl.BlockSpec((1, N), lambda b: (0, 0)),
                pl.BlockSpec((1, N), lambda b: (0, 0)),
                pl.BlockSpec((2 * C, 9 * Cin), lambda b: (0, 0)),
                pl.BlockSpec((2 * C, 1), lambda b: (0, 0)),
                pl.BlockSpec((C, 9 * C), lambda b: (0, 0)),
                pl.BlockSpec((C, 1), lambda b: (0, 0)),
                pl.BlockSpec((A, C), lambda b: (0, 0)),
                pl.BlockSpec((A, 1), lambda b: (0, 0)),
                pl.BlockSpec((2 * C, A), lambda b: (0, 0)),
            ],
            out_specs=pl.BlockSpec((1, C, N), lambda b: (b, 0, 0)),
            scratch_shapes=[pltpu.VMEM((9 * Cin, N), jnp.float32)],  # im2col slab
        ),
        compiler_params=pltpu.CompilerParams(
            dimension_semantics=("parallel",)),
        cost_estimate=pl.CostEstimate(
            flops=flops, transcendentals=B * 2 * C * N,
            bytes_accessed=bytes_accessed),
    )(x_flat, hh_idx, ww_idx, w1c, b1, w2t, b2, wred, battn, wsel)

    return out_flat.reshape(B, C, H, W)


# ----------------------------------------------------------------------------
# Pure-JAX reference (same eval-mode semantics) for the correctness check.
# ----------------------------------------------------------------------------
def reference_forward(x_nchw, p):
    x = jnp.transpose(x_nchw, (0, 2, 3, 1))
    cin = x.shape[-1]
    half = cin // 2

    def cbr(xi, w, scale, bias, d, relu):
        y = lax.conv_general_dilated(
            xi, w, (1, 1), [(d, d), (d, d)], rhs_dilation=(d, d),
            dimension_numbers=("NHWC", "HWIO", "NHWC"),
            precision=lax.Precision.HIGHEST)
        y = y * scale + bias
        return jnp.maximum(y, 0.0) if relu else y

    p0 = cbr(x[..., :half], p["w_p0"], p["s_p0"], p["b_p0"], 1, True)
    p1 = cbr(x[..., half:], p["w_p1"], p["s_p1"], p["b_p1"], 2, True)
    s = p0 + p1
    m = jnp.mean(s, axis=(1, 2))                        # (B, C)
    z = m @ p["w_red"]
    z = jnp.maximum(z * p["s_attn"] + p["b_attn"], 0.0)
    a = jnp.stack([z @ p["w_sel0"], z @ p["w_sel1"]], axis=1)  # (B, 2, C)
    att = jax.nn.softmax(a, axis=1)
    sel = p0 * att[:, 0][:, None, None, :] + p1 * att[:, 1][:, None, None, :]
    y = cbr(sel, p["w_c2"], p["s_c2"], p["b_c2"], 1, False)
    y = jnp.maximum(y + x, 0.0)
    return jnp.transpose(y, (0, 3, 1, 2))


# ----------------------------------------------------------------------------
# Deterministic parameter init (shapes follow the module __init__, BN folded).
# ----------------------------------------------------------------------------
def init_params(key, inplanes, planes, attn_channels):
    half = inplanes // 2
    ks = list(jax.random.split(key, 10))

    def conv_w(k, kh, kw, ci, co):
        fan_in = kh * kw * ci
        return (jax.random.normal(k, (kh, kw, ci, co), jnp.float32)
                * np.sqrt(2.0 / fan_in))

    def bn_fold(k, c):
        k1, k2, k3, k4 = jax.random.split(k, 4)
        gamma = jax.random.uniform(k1, (c,), jnp.float32, 0.5, 1.5)
        beta = jax.random.normal(k2, (c,), jnp.float32) * 0.1
        mean = jax.random.normal(k3, (c,), jnp.float32) * 0.1
        var = jax.random.uniform(k4, (c,), jnp.float32, 0.5, 1.5)
        scale = gamma / jnp.sqrt(var + 1e-5)
        bias = beta - mean * scale
        return scale, bias

    s_p0, b_p0 = bn_fold(ks[1], planes)
    s_p1, b_p1 = bn_fold(ks[3], planes)
    s_attn, b_attn = bn_fold(ks[5], attn_channels)
    s_c2, b_c2 = bn_fold(ks[8], planes)
    w_sel = conv_w(ks[6], 1, 1, attn_channels, 2 * planes)[0, 0]  # (A, 2C)
    return dict(
        w_p0=conv_w(ks[0], 3, 3, half, planes), s_p0=s_p0, b_p0=b_p0,
        w_p1=conv_w(ks[2], 3, 3, half, planes), s_p1=s_p1, b_p1=b_p1,
        w_red=conv_w(ks[4], 1, 1, planes, attn_channels)[0, 0],   # (C, A)
        s_attn=s_attn, b_attn=b_attn,
        w_sel0=w_sel[:, :planes], w_sel1=w_sel[:, planes:],
        w_c2=conv_w(ks[7], 3, 3, planes, planes), s_c2=s_c2, b_c2=b_c2,
    )


if __name__ == "__main__":
    B, C, H, W = 2, 8, 16, 16          # inplanes == planes, stride=1, no downsample
    attn_channels = 8                   # make_divisible(8 * 1/16, 8) == 8

    key = jax.random.PRNGKey(0)
    kx, kp = jax.random.split(key)
    x = jax.random.normal(kx, (B, C, H, W), jnp.float32)
    params = init_params(kp, C, C, attn_channels)

    _ = _roll_is_numpy_style()          # prime the (cached) roll-direction probe

    fwd = jax.jit(functools.partial(selective_kernel_basic, p=params))
    out = fwd(x)
    jax.block_until_ready(out)

    ref = reference_forward(x, params)
    np.testing.assert_allclose(np.asarray(out), np.asarray(ref),
                               rtol=1e-3, atol=1e-3)
    print("KERNEL_OK")
</pallas_src>

<mosaic_0001>
module attributes {stable_mosaic.version = 11 : i64} {
  func.func @kernel(%arg0: memref<8x128xf32, #tpu.memory_space<vmem>>, %arg1: memref<8x128xf32, #tpu.memory_space<vmem>>) attributes {dimension_semantics = [], scalar_prefetch = 0 : i64, scratch_operands = 0 : i64, tpu.core_type = #tpu.core_type<tc>} {
    %c0 = arith.constant 0 : index
    %c0_0 = arith.constant 0 : index
    %0 = vector.load %arg0[%c0, %c0_0] : memref<8x128xf32, #tpu.memory_space<vmem>>, vector<8x128xf32>
    %c1_i32 = arith.constant 1 : i32
    %1 = tpu.dynamic_rotate %0 by %c1_i32 dim 1 : vector<8x128xf32>, i32 -> vector<8x128xf32>
    %c0_1 = arith.constant 0 : index
    %c0_2 = arith.constant 0 : index
    %2 = vector.load %arg1[%c0_1, %c0_2] : memref<8x128xf32, #tpu.memory_space<vmem>>, vector<8x128xf32>
    tpu.vector_store %arg1[%c0_1, %c0_2], %1 {strides = array<i32>} : memref<8x128xf32, #tpu.memory_space<vmem>>, vector<8x128xf32>,
    return
  }
}

</mosaic_0001>

<bundles_post_ra>
// kernel: tpu_custom_call.1
= control target key start
LH: loop header
LB: loop body
LE: loop exit
PB: predicated region body
PF: predicated region fallthrough
CT: control target
= control target key end

     0   :  { %6 = vsyncpa [#allocation3], 0  ;;  %s106_s0 = inlined_call_operand.hbm [shape: f32[8,128], index: 0, kind: input, shape index: {}]   ;;  %s107_s1 = inlined_call_operand.hbm [shape: f32[8,128], index: 1, kind: output, shape index: {}]  }
   0x1   :  { %7 = vsyncpa [#allocation4], 0  ;;  %s87_s6 = smov [#allocation2]  }
   0x2   :  { %s14_s7 = sshll.u32 %s87_s6, 4  ;;  %s15_s7 = int_to_ptr.vmem [resolvable:$true] %s14_s7 }
   0x3   :  { %s51_s8 = scalar_lea.vmem %s15_s7, 128  ;;  %p56_p1 = scmp.lt.s32.totalorder %s15_s7, %s15_s7 }
   0x4   :  { %p52_p0 = scmp.ne.s32.totalorder %s15_s7, %s51_s8  ;;  %p57_p2 = scmp.lt.s32.totalorder %s51_s8, %s51_s8 }
   0x6   :  { %p58_p3 = por %p57_p2, %p56_p1 }
   0x8   :  { %p59_p4 = pnand %p58_p3, %p52_p0 }
   0xa   :  { %62 = shalt.err (!%p59_p4)
}
   0xb   :  { %17 = dma.hbm_to_vmem [thread:$0]  %s106_s0, 128, %s15_s7, [#allocation3]  }
   0xc   :  { %83 = dma.done.wait [#allocation3], 128  }
   0xd   :  { %84 = vsyncadd [#allocation3], 4294967168  ;;  %v21_v0 = vld [vmem:[#allocation2] sm:$0xff]  ;;  %s88_s11 = smov 1   ;;  %s89_s12 = smov [#allocation5]  }
   0xe   :  { %22 = vrot.lane.b32.xlu0 %v21_v0, %s88_s11  ;;  %s31_s13 = sshll.u32 %s89_s12, 4  ;;  %s32_s13 = int_to_ptr.vmem [resolvable:$true] %s31_s13 }
   0xf   :  { %s63_s14 = scalar_lea.vmem %s32_s13, 128  ;;  %p68_p6 = scmp.lt.s32.totalorder %s32_s13, %s32_s13 }
  0x10   :  { %p64_p5 = scmp.ne.s32.totalorder %s32_s13, %s63_s14  ;;  %p69_p7 = scmp.lt.s32.totalorder %s63_s14, %s63_s14 }
  0x12   :  { %p70_p8 = por %p69_p7, %p68_p6 }
  0x14   :  { %p71_p9 = pnand %p70_p8, %p64_p5 }
  0x80   :  { %v23_v1 = vpop.permute.xlu0 %22 }
  0x81   :  { %24 = vst [vmem:[#allocation5] sm:$0xff] %v23_v1 }
  0x82   :  { %74 = shalt.err (!%p71_p9)
}
  0x83   :  { %34 = dma.vmem_to_hbm [thread:$0]  %s32_s13, 128, %s107_s1, [#allocation4]  }
  0x84   :  { %85 = dma.done.wait [#allocation4], 128  }
  0x85   :  { %86 = vsyncadd [#allocation4], 4294967168 }
  0x86   :  { %38 = vsyncpa [#allocation3], 1 }
  0x87   :  { %39 = vsyncpa [#allocation4], 1 }

</bundles_post_ra>
